<compile_context>
chip_gen: v7x
topology: tpu7x:2x2x1
jax: 0.10.0
libtpu: 0.0.40
codegen_flags: <defaults>
</compile_context>

<pallas_src>
import functools

import jax
import jax.numpy as jnp
from jax.experimental import pallas as pl
from jax.experimental.pallas import tpu as pltpu

_LANES = 128
_SUBLANES = 8
# 4096 rows x 128 lanes x f32 = 2 MiB per block.  Double-buffered input +
# gradient output is ~8 MiB, plus a handful of full-block VPU temporaries,
# under the 32 MiB scoped-VMEM default on v5e/v6e/v7x.
_MAX_TILE_ROWS = 4096
# Only split a single block in two (for the v7x megacore) if each half keeps
# at least this many rows -- below that, per-step overhead dominates.
_MIN_SPLIT_ROWS = 2048
_VMEM_LIMIT = 32 * 1024 * 1024


def _round_up(a, b):
    return ((a + b - 1) // b) * b


def _plan(n):
    """Tile plan for an n-variable problem: (padded_rows, tile_r, num_tiles)."""
    rows = _round_up(max(n, 1), _LANES) // _LANES
    rows = _round_up(rows, _SUBLANES)
    num_tiles = max(1, -(-rows // _MAX_TILE_ROWS))
    if num_tiles == 1 and rows >= 2 * _MIN_SPLIT_ROWS:
        num_tiles = 2  # give both v7x TensorCores a grid step
    tile_r = _round_up(-(-rows // num_tiles), _SUBLANES)
    padded_rows = tile_r * num_tiles
    return padded_rows, tile_r, num_tiles


def _to_tiles(x, padded_rows):
    """Pad x (1-D, even length) with 1.0 and reshape to (padded_rows, 128).

    A padded (1.0, 1.0) pair contributes exactly zero objective and zero
    gradient, so no in-kernel masking of the ragged tail is needed.  When the
    length is already tile-complete no copy is made.
    """
    n = x.shape[0]
    n_pad = padded_rows * _LANES
    xf = x.astype(jnp.float32)
    if n_pad != n:
        xf = jnp.concatenate([xf, jnp.ones((n_pad - n,), jnp.float32)])
    return xf.reshape(padded_rows, _LANES)


def _pair_terms(x):
    """Lane-parity split + Rosenbrock pair terms on the raw interleaved vector.

    Even lanes hold x_o, the paired x_e sits one lane to the right.  Quantities
    are only meaningful at even (x_o) lanes; callers mask with `is_xo`.
    """
    lane = jax.lax.broadcasted_iota(jnp.int32, x.shape, dimension=1)
    is_xo = (lane & 1) == 0
    # roll by 127 == roll by -1 (mod 128): at even lanes x_next == paired x_e.
    x_next = pltpu.roll(x, shift=127, axis=1)
    t = x_next - x * x          # x_e - x_o^2
    u = 1.0 - x                 # 1 - x_o
    return is_xo, t, u


def _tile_psum(contrib):
    """Reduce a (tile_r, 128) contribution block to a sublane-complete (8, 128)
    partial sum using pure VPU adds (no in-vreg sublane reduce)."""
    return jnp.sum(contrib.reshape(-1, _SUBLANES, _LANES), axis=0)


def _srosenbr_obj_grad_kernel(x_ref, psum_ref, grad_ref):
    """Extended Rosenbrock: per-tile partial objective sum + gradient.

    f(x) = sum_i 100*(x_e[i] - x_o[i]^2)^2 + (1 - x_o[i])^2,
    x_o = x[0::2], x_e = x[1::2]; pairs map to (even lane, odd lane).
    """
    x = x_ref[...]                                 # (tile_r, 128) f32
    is_xo, t, u = _pair_terms(x)

    ge = 200.0 * t                                 # d f / d x_e
    go = -2.0 * (x * ge + u)                       # d f / d x_o (= -400*xo*t - 2*u)
    # Gradient already in the original interleaved layout: even lanes take go,
    # odd lanes take ge shifted right one lane (back onto the x_e position).
    grad_ref[...] = jnp.where(is_xo, go, pltpu.roll(ge, shift=1, axis=1))

    contrib = jnp.where(is_xo, 100.0 * t * t + u * u, 0.0)
    psum_ref[...] = _tile_psum(contrib)[None]


def _srosenbr_obj_kernel(x_ref, psum_ref):
    """Objective-only variant: no gradient writeback (halves HBM traffic)."""
    x = x_ref[...]
    is_xo, t, u = _pair_terms(x)
    contrib = jnp.where(is_xo, 100.0 * t * t + u * u, 0.0)
    psum_ref[...] = _tile_psum(contrib)[None]


def _run_obj_grad(x2, tile_r, num_tiles):
    padded_rows = x2.shape[0]
    psum, grad = pl.pallas_call(
        _srosenbr_obj_grad_kernel,
        out_shape=(
            jax.ShapeDtypeStruct((num_tiles, _SUBLANES, _LANES), jnp.float32),
            jax.ShapeDtypeStruct((padded_rows, _LANES), jnp.float32),
        ),
        grid=(num_tiles,),
        in_specs=[pl.BlockSpec((tile_r, _LANES), lambda i: (i, 0))],
        out_specs=(
            pl.BlockSpec((1, _SUBLANES, _LANES), lambda i: (i, 0, 0)),
            pl.BlockSpec((tile_r, _LANES), lambda i: (i, 0)),
        ),
        compiler_params=pltpu.CompilerParams(
            dimension_semantics=("parallel",),
            vmem_limit_bytes=_VMEM_LIMIT,
        ),
    )(x2)
    return jnp.sum(psum), grad


def _run_obj(x2, tile_r, num_tiles):
    psum = pl.pallas_call(
        _srosenbr_obj_kernel,
        out_shape=jax.ShapeDtypeStruct((num_tiles, _SUBLANES, _LANES), jnp.float32),
        grid=(num_tiles,),
        in_specs=[pl.BlockSpec((tile_r, _LANES), lambda i: (i, 0))],
        out_specs=pl.BlockSpec((1, _SUBLANES, _LANES), lambda i: (i, 0, 0)),
        compiler_params=pltpu.CompilerParams(
            dimension_semantics=("parallel",),
            vmem_limit_bytes=_VMEM_LIMIT,
        ),
    )(x2)
    return jnp.sum(psum)


def cutest_srosenbr_obj_and_grad(x):
    """Objective and gradient at x (1-D, length N, N even)."""
    n = x.shape[0]
    assert n % 2 == 0, "extended Rosenbrock needs an even number of variables"
    padded_rows, tile_r, num_tiles = _plan(n)
    x2 = _to_tiles(x, padded_rows)
    obj, grad2 = _run_obj_grad(x2, tile_r, num_tiles)
    grad = grad2.reshape(padded_rows * _LANES)
    if padded_rows * _LANES != n:
        grad = grad[:n]
    return obj, grad


def cutest_srosenbr_obj(x):
    """Objective only at x (1-D, length N, N even)."""
    n = x.shape[0]
    assert n % 2 == 0, "extended Rosenbrock needs an even number of variables"
    padded_rows, tile_r, num_tiles = _plan(n)
    x2 = _to_tiles(x, padded_rows)
    return _run_obj(x2, tile_r, num_tiles)


class CUTEstProblemPallas:
    """Pallas analogue of the PyTorch CUTEstProblem module (SROSENBR instance).

    forward() returns the scalar objective at the current parameters, exactly
    like the PyTorch module's forward pass.
    """

    def __init__(self, x0, dtype=jnp.float32):
        self.dtype = dtype
        self.variables = x0.astype(dtype)           # the nn.Parameter analogue
        n = int(x0.shape[0])
        padded_rows, tile_r, num_tiles = _plan(n)
        # Pre-padded parameter tiles: forward() pays no per-call pad/copy.
        self._x2 = _to_tiles(self.variables, padded_rows)
        self._forward_fn = jax.jit(
            functools.partial(_run_obj, tile_r=tile_r, num_tiles=num_tiles))
        self._obj_fn = jax.jit(cutest_srosenbr_obj)
        self._obj_grad_fn = jax.jit(cutest_srosenbr_obj_and_grad)

    def forward(self):
        return self._forward_fn(self._x2).astype(self.dtype)

    def get_obj(self, x):
        return self._obj_fn(x).astype(self.dtype)

    def get_grad(self, x):
        _, grad = self._obj_grad_fn(x)
        return grad.astype(self.dtype)


def _reference_obj_and_grad(x):
    """Pure-JAX reference for correctness checking."""
    x2 = x.reshape(-1, 2)
    xo, xe = x2[:, 0], x2[:, 1]
    t = xe - xo * xo
    u = 1.0 - xo
    obj = jnp.sum(100.0 * t * t + u * u)
    go = -400.0 * xo * t - 2.0 * u
    ge = 200.0 * t
    grad = jnp.stack([go, ge], axis=1).reshape(-1)
    return obj, grad


if __name__ == "__main__":
    key = jax.random.PRNGKey(0)

    # N = 1024 variables -> 512 Rosenbrock pairs -> a single (8, 128) tile.
    N = 1024
    x0 = jnp.tile(jnp.array([-1.2, 1.0], dtype=jnp.float32), N // 2)
    x0 = x0 + 0.01 * jax.random.normal(key, (N,), dtype=jnp.float32)

    model = CUTEstProblemPallas(x0)
    obj = model.forward()                     # objective-only kernel
    obj2 = model.get_obj(x0)                  # objective-only kernel (1-D path)
    grad = model.get_grad(model.variables)    # fused obj+grad kernel
    jax.block_until_ready((obj, obj2, grad))

    ref_obj, ref_grad = _reference_obj_and_grad(x0)
    assert jnp.allclose(obj, ref_obj, rtol=1e-4, atol=1e-3), (obj, ref_obj)
    assert jnp.allclose(obj2, ref_obj, rtol=1e-4, atol=1e-3), (obj2, ref_obj)
    assert jnp.allclose(grad, ref_grad, rtol=1e-4, atol=1e-3)

    # Ragged size (not a multiple of 128) exercises the padded-tile path.
    M = 300
    xr = jnp.tile(jnp.array([-1.2, 1.0], dtype=jnp.float32), M // 2)
    xr = xr + 0.01 * jax.random.normal(jax.random.PRNGKey(1), (M,), jnp.float32)
    obj_r, grad_r = jax.jit(cutest_srosenbr_obj_and_grad)(xr)
    jax.block_until_ready((obj_r, grad_r))
    ref_obj_r, ref_grad_r = _reference_obj_and_grad(xr)
    assert jnp.allclose(obj_r, ref_obj_r, rtol=1e-4, atol=1e-3)
    assert jnp.allclose(grad_r, ref_grad_r, rtol=1e-4, atol=1e-3)

    print("KERNEL_OK")
</pallas_src>

<mosaic_0001>
module attributes {stable_mosaic.version = 11 : i64} {
  func.func @_srosenbr_obj_kernel(%arg0: i32, %arg1: memref<8x128xf32, #tpu.memory_space<vmem>>, %arg2: memref<1x8x128xf32, #tpu.memory_space<vmem>>) attributes {dimension_semantics = [#tpu.dimension_semantics<parallel>], iteration_bounds = array<i64: 1>, scalar_prefetch = 0 : i64, scratch_operands = 0 : i64, tpu.core_type = #tpu.core_type<tc>, window_params = [{transform_indices = @transform_0, window_bounds = array<i64: 8, 128>}, {transform_indices = @transform_1, window_bounds = array<i64: 1, 8, 128>}]} {
    %c0 = arith.constant 0 : index
    %c0_0 = arith.constant 0 : index
    %0 = vector.load %arg1[%c0, %c0_0] : memref<8x128xf32, #tpu.memory_space<vmem>>, vector<8x128xf32>
    %1 = tpu.iota {dimensions = array<i32: 1>} : vector<8x128xi32>
    %c1_i32 = arith.constant 1 : i32
    %2 = vector.broadcast %c1_i32 : i32 to vector<8x128xi32>
    %3 = arith.andi %1, %2 : vector<8x128xi32>
    %c0_i32 = arith.constant 0 : i32
    %4 = vector.broadcast %c0_i32 : i32 to vector<8x128xi32>
    %5 = arith.cmpi eq, %3, %4 : vector<8x128xi32>
    %c127_i32 = arith.constant 127 : i32
    %6 = tpu.dynamic_rotate %0 by %c127_i32 dim 1 : vector<8x128xf32>, i32 -> vector<8x128xf32>
    %7 = arith.mulf %0, %0 : vector<8x128xf32>
    %8 = arith.subf %6, %7 : vector<8x128xf32>
    %cst = arith.constant 1.000000e+00 : f32
    %9 = vector.broadcast %cst : f32 to vector<8x128xf32>
    %10 = arith.subf %9, %0 : vector<8x128xf32>
    %cst_1 = arith.constant 1.000000e+02 : f32
    %11 = vector.broadcast %cst_1 : f32 to vector<8x128xf32>
    %12 = arith.mulf %11, %8 : vector<8x128xf32>
    %13 = arith.mulf %12, %8 : vector<8x128xf32>
    %14 = arith.mulf %10, %10 : vector<8x128xf32>
    %15 = arith.addf %13, %14 : vector<8x128xf32>
    %cst_2 = arith.constant 0.000000e+00 : f32
    %16 = vector.broadcast %cst_2 : f32 to vector<8x128xf32>
    %17 = arith.select %5, %15, %16 : vector<8x128xi1>, vector<8x128xf32>
    %18 = vector.shape_cast %17 : vector<8x128xf32> to vector<1x8x128xf32>
    %cst_3 = arith.constant dense<0.000000e+00> : vector<8x128xf32>
    %19 = vector.multi_reduction <add>, %18, %cst_3 [0] : vector<1x8x128xf32> to vector<8x128xf32>
    %20 = vector.shape_cast %19 : vector<8x128xf32> to vector<1x8x128xf32>
    %c0_4 = arith.constant 0 : index
    %c0_5 = arith.constant 0 : index
    %c0_6 = arith.constant 0 : index
    %21 = vector.load %arg2[%c0_4, %c0_5, %c0_6] : memref<1x8x128xf32, #tpu.memory_space<vmem>>, vector<1x8x128xf32>
    tpu.vector_store %arg2[%c0_4, %c0_5, %c0_6], %20 {strides = array<i32>} : memref<1x8x128xf32, #tpu.memory_space<vmem>>, vector<1x8x128xf32>,
    return
  }
  func.func @transform_0(%arg0: i32) -> (i32, i32) {
    %c0_i32 = arith.constant 0 : i32
    %c0_i32_0 = arith.constant 0 : i32
    return %arg0, %c0_i32 : i32, i32
  }
  func.func @transform_1(%arg0: i32) -> (i32, i32, i32) {
    %c0_i32 = arith.constant 0 : i32
    %c0_i32_0 = arith.constant 0 : i32
    %c0_i32_1 = arith.constant 0 : i32
    return %arg0, %c0_i32, %c0_i32_0 : i32, i32, i32
  }
}

</mosaic_0001>

<bundles_post_ra>
// kernel: _run_obj.1
= control target key start
LH: loop header
LB: loop body
LE: loop exit
PB: predicated region body
PF: predicated region fallthrough
CT: control target
= control target key end

     0   :  { %6 = vsyncpa [#allocation3], 0  ;;  %s68_s6 = smov [#allocation2]   ;;  %s95_s0 = inlined_call_operand.hbm [shape: f32[8,128], index: 0, kind: input, shape index: {}]   ;;  %s96_s1 = inlined_call_operand.vmem [shape: f32[1,8,128], index: 1, kind: output, shape index: {}]  }
   0x1   :  { %s13_s7 = sshll.u32 %s68_s6, 4  ;;  %s44_s10 = scalar_lea.hbm %s95_s0, 128  ;;  %s14_s7 = int_to_ptr.vmem [resolvable:$true] %s13_s7 }
   0x2   :  { %p45_p0 = scmp.ne.s32.totalorder %s95_s0, %s44_s10  ;;  %p48_p1 = scmp.lt.u32.totalorder %s44_s10, %s95_s0 }
   0x4   :  { %p50_p2 = pnand %p48_p1, %p45_p0 }
   0x6   :  { %53 = shalt.err (!%p50_p2)
}
   0x7   :  { %s54_s15 = scalar_lea.vmem %s14_s7, 128  ;;  %p59_p4 = scmp.lt.s32.totalorder %s14_s7, %s14_s7 }
   0x8   :  { %p55_p3 = scmp.ne.s32.totalorder %s14_s7, %s54_s15  ;;  %p60_p5 = scmp.lt.s32.totalorder %s54_s15, %s54_s15 }
   0xa   :  { %p61_p6 = por %p60_p5, %p59_p4 }
   0xc   :  { %p62_p7 = pnand %p61_p6, %p55_p3 }
   0xe   :  { %65 = shalt.err (!%p62_p7)
}
   0xf   :  { %16 = dma.hbm_to_vmem [thread:$0]  %s95_s0, 128, %s14_s7, [#allocation3]  }
  0x10   :  { %66 = dma.done.wait [#allocation3], 128  }
  0x11   :  { %67 = vsyncadd [#allocation3], 4294967168  ;;  %v20_v0 = vld [vmem:[#allocation2] sm:$0xff]  ;;  %s69_s18 = smov 127   ;;  %v21_v1 = vlaneseq }
  0x12   :  { %25 = vrot.lane.b32.xlu0 %v20_v0, %s69_s18  ;;  %v27_v2 = vmul.f32 %v20_v0, %v20_v0  ;;  %v29_v4 = vsub.f32 1.0, %v20_v0 }
  0x13   :  { %v22_v3 = vand.u32 127, %v21_v1 }
  0x14   :  { %v32_v8 = vmul.f32 %v29_v4, %v29_v4 }
  0x15   :  { %v23_v7 = vand.u32 1, %v22_v3 }
  0x17   :  { %vm24_vm0 = vcmp.eq.s32.totalorder %v23_v7, 0 }
  0x84   :  { %v26_v5 = vpop.permute.xlu0 %25 }
  0x85   :  { %v28_v6 = vsub.f32 %v26_v5, %v27_v2 }
  0x87   :  { %v30_v9 = vmul.f32 100.0, %v28_v6 }
  0x89   :  { %v31_v10 = vmul.f32 %v30_v9, %v28_v6 }
  0x8b   :  { %v33_v11 = vadd.f32 %v32_v8, %v31_v10 }
  0x8d   :  { %v34_v12 = vsel %vm24_vm0, %v33_v11, 0.0 }
  0x8e   :  { %36 = vst [vmem:[%s96_s1] sm:$0xff] %v34_v12 }
  0x8f   :  { %41 = vsyncpa [#allocation3], 1 }

</bundles_post_ra>
